<compile_context>
chip_gen: v5e
topology: v5e:2x2
jax: 0.10.0
libtpu: 0.0.40
codegen_flags: <defaults>
</compile_context>

<pallas_src>
import functools

import jax
import jax.numpy as jnp
import numpy as np
from jax.experimental import pallas as pl
from jax.experimental.pallas import tpu as pltpu


# -----------------------------------------------------------------------------
# Kernel 1: video preprocessing (clamp / rescale / per-channel normalize)
# -----------------------------------------------------------------------------
def _preprocess_kernel(scale_ref, bias_ref, x_ref, o_ref, *, num_channels):
    # Grid axis 0 runs over flattened (batch, channel) pairs; channel index for
    # the prefetched SMEM scale/bias lookup:
    c = pl.program_id(0) % num_channels
    x = x_ref[...]                                        # (tile_r, L)
    # (clip(x,-1,1)+1)*0.5 normalized by (mean, std), folded into scale/bias.
    o_ref[...] = jnp.clip(x, -1.0, 1.0) * scale_ref[c] + bias_ref[c]


def _pick_lane_dim(n, max_l=1024):
    """Largest multiple of 128 <= max_l dividing n (n must be a 128-multiple)."""
    l = (max_l // 128) * 128
    while l >= 128:
        if n % l == 0:
            return l
        l -= 128
    return None


def preprocess_video(video, mean, std, vmem_budget_bytes=24 * 1024 * 1024):
    """video: [B, C, T, H, W] float32 in [-1, 1]. Returns same shape, normalized."""
    B, C, T, H, W = video.shape
    THW = T * H * W

    # Lane-dense flattening. If T*H*W is not a multiple of 128, pad the
    # flattened axis so the kernel always sees an unmasked 128-multiple lane
    # dim (pad/slice are cheap XLA copies on the fallback path only).
    flat = video.reshape(B * C, THW).astype(jnp.float32)
    if THW % 128 == 0:
        THW_pad = THW
    else:
        THW_pad = ((THW + 127) // 128) * 128
        flat = jnp.pad(flat, ((0, 0), (0, THW_pad - THW)))
    L = _pick_lane_dim(THW_pad)
    R = THW_pad // L
    v = flat.reshape(B * C, R, L)

    # Fold the affine normalization into two per-channel scalars (scalar
    # prefetch -> SMEM before the grid runs).
    scale = (0.5 / std).astype(jnp.float32)               # (C,)
    bias = ((0.5 - mean) / std).astype(jnp.float32)       # (C,)

    # Row-tile sizing: 4 resident copies (double-buffered input + output) must
    # fit the budget. Default 24 MiB -> ~6 MiB tiles: amortizes per-step
    # overhead on v7x and leaves headroom under its 64 MiB physical VMEM
    # (v5e/v6e have 128 MiB, trivially fine).
    bytes_per_row = L * 4
    max_rows = max(8, vmem_budget_bytes // (4 * bytes_per_row))
    if R <= max_rows:
        tile_r = R                       # full extent (always legal)
    else:
        tile_r = max(8, (max_rows // 8) * 8)
    grid_r = pl.cdiv(R, tile_r)

    n_elem = B * C * THW_pad
    cost = pl.CostEstimate(flops=4 * n_elem, transcendentals=0,
                           bytes_accessed=2 * n_elem * 4)

    kern = functools.partial(_preprocess_kernel, num_channels=C)
    out = pl.pallas_call(
        kern,
        out_shape=jax.ShapeDtypeStruct((B * C, R, L), jnp.float32),
        grid_spec=pltpu.PrefetchScalarGridSpec(
            num_scalar_prefetch=2,                        # scale, bias
            grid=(B * C, grid_r),
            in_specs=[
                pl.BlockSpec((pl.Squeezed(), tile_r, L),
                             lambda bc, r, scale_ref, bias_ref: (bc, r, 0)),
            ],
            out_specs=pl.BlockSpec((pl.Squeezed(), tile_r, L),
                                   lambda bc, r, scale_ref, bias_ref: (bc, r, 0)),
        ),
        compiler_params=pltpu.CompilerParams(
            dimension_semantics=("parallel", "parallel"),
            vmem_limit_bytes=48 * 1024 * 1024),
        cost_estimate=cost,
    )(scale, bias, v)

    out = out.reshape(B * C, THW_pad)
    if THW_pad != THW:
        out = out[:, :THW]
    return out.reshape(B, C, T, H, W)


def pad_frames(video, frames_per_clip):
    """Repeat the last frame up to frames_per_clip (plain-JAX glue, matches torch)."""
    b, c, t, h, w = video.shape
    if t >= frames_per_clip:
        return video
    last = jnp.repeat(video[:, :, -1:], frames_per_clip - t, axis=2)
    return jnp.concatenate([video, last], axis=2)


# -----------------------------------------------------------------------------
# Kernel 2: MMD with polynomial kernel (degree=2, gamma=1/dim, coef0=0),
# restructured as per-stream streamed D x D Gram accumulation.
# -----------------------------------------------------------------------------
def _make_gram_kernel(row_scale):
    """Accumulate (row_scale * A_tile)^T (row_scale * A_tile) into the resident
    (D, D) output block (one block per 'core' grid index)."""
    dn = (((0,), (0,)), ((), ()))        # contract the row axis of both operands

    def kernel(a_ref, o_ref):
        t = pl.program_id(1)

        @pl.when(t == 0)
        def _():
            o_ref[...] = jnp.zeros_like(o_ref)

        a = a_ref[...] * row_scale                        # (tile_n, D), f32
        # TODO(synk): bf16 tile cast (keep f32 accumulation) is the remaining
        # MXU lever, but the degree-2 squaring needs a precision study first.
        o_ref[...] += jax.lax.dot_general(a, a, dn,
                                          preferred_element_type=jnp.float32)

    return kernel


def _gram_partials(A, n_valid, tile_n=256, max_cores=2):
    """Per-core partial Grams of A, pre-scaled by 1/n_valid.

    Returns (ncores * D, D) f32; the vertical sum of the ncores (D, D) blocks
    equals A^T A / n_valid (zero-padded rows contribute nothing)."""
    n, D = A.shape
    assert D % 8 == 0, "embed dim must be a multiple of 8"
    ntiles = pl.cdiv(n, tile_n)
    ncores = min(max_cores, ntiles)      # leading "parallel" axis -> 2 TCs on v7x
    tiles_per_core = pl.cdiv(ntiles, ncores)
    total_tiles = ncores * tiles_per_core
    npad = total_tiles * tile_n

    A32 = A.astype(jnp.float32)
    if npad != n:
        Ap = jnp.zeros((npad, D), jnp.float32).at[:n].set(A32)
    else:
        Ap = A32

    # Fold 1/n into the accumulation (rows scaled by n^-1/2) so accumulator
    # entries stay O(1) regardless of sample count.
    row_scale = 1.0 / float(np.sqrt(n_valid))

    cost = pl.CostEstimate(flops=2 * npad * D * D + npad * D,
                           transcendentals=0,
                           bytes_accessed=npad * D * 4 + ncores * D * D * 4)

    # TODO(synk): for embed dims >= ~1536 the resident (D, D) output block plus
    # double-buffered inputs approach v7x's 64 MiB VMEM; tile the Gram's output
    # D axis with an extra grid dimension in that regime.
    return pl.pallas_call(
        _make_gram_kernel(row_scale),
        out_shape=jax.ShapeDtypeStruct((ncores * D, D), jnp.float32),
        grid=(ncores, tiles_per_core),
        in_specs=[
            pl.BlockSpec((tile_n, D),
                         lambda c, t: (c * tiles_per_core + t, 0)),
        ],
        out_specs=pl.BlockSpec((D, D), lambda c, t: (c, 0)),
        compiler_params=pltpu.CompilerParams(
            dimension_semantics=("parallel", "arbitrary"),
            vmem_limit_bytes=48 * 1024 * 1024),
        cost_estimate=cost,
    )(Ap)


def _make_finalize_kernel(ncx, ncy, D, gamma2):
    def kernel(gx_ref, gy_ref, o_ref):
        gx = gx_ref[0:D, :]
        for c in range(1, ncx):
            gx = gx + gx_ref[c * D:(c + 1) * D, :]
        gy = gy_ref[0:D, :]
        for c in range(1, ncy):
            gy = gy + gy_ref[c * D:(c + 1) * D, :]
        # Single fused pass; sxx/nx^2 + syy/ny^2 - 2 sxy/(nx ny) collapses to a
        # cancellation-free ||Gx/nx - Gy/ny||_F^2 because 1/n is pre-folded.
        diff = gx - gy
        o_ref[0, 0] = gamma2 * jnp.sum(diff * diff)
    return kernel


def mmd_poly_pallas(X, Y, degree=2, coef0=0.0, tile_n=256):
    """MMD with polynomial kernel matching sklearn-based mmd_poly
    (degree=2, coef0=0, gamma=1/dim)."""
    # TODO(synk): the streamed Gram identity only holds for degree=2, coef0=0
    # (exactly what JEDiMetric.gather() uses).
    assert degree == 2 and coef0 == 0.0
    nx, dx = X.shape
    ny, dy = Y.shape
    assert dx == dy
    D = dx

    gx_parts = _gram_partials(X, nx, tile_n=tile_n)       # (ncx*D, D)
    gy_parts = _gram_partials(Y, ny, tile_n=tile_n)       # (ncy*D, D)
    ncx = gx_parts.shape[0] // D
    ncy = gy_parts.shape[0] // D

    gamma = 1.0 / float(D)                                # sklearn gamma=None default
    gamma2 = gamma * gamma

    out = pl.pallas_call(
        _make_finalize_kernel(ncx, ncy, D, gamma2),
        out_shape=jax.ShapeDtypeStruct((1, 1), jnp.float32),
        in_specs=[pl.BlockSpec(memory_space=pltpu.MemorySpace.VMEM),
                  pl.BlockSpec(memory_space=pltpu.MemorySpace.VMEM)],
        out_specs=pl.BlockSpec(memory_space=pltpu.MemorySpace.SMEM),
        compiler_params=pltpu.CompilerParams(
            vmem_limit_bytes=48 * 1024 * 1024),
    )(gx_parts, gy_parts)
    return out[0, 0]


def jedi_gather(target_feats, recon_feats):
    """Equivalent of JEDiMetric.gather(): mmd_poly(target, recon, degree=2)*100."""
    return mmd_poly_pallas(target_feats, recon_feats) * 100.0


# -----------------------------------------------------------------------------
# Pure-JAX references (for correctness check only)
# -----------------------------------------------------------------------------
def _mmd_poly_ref(X, Y, degree=2, coef0=0.0):
    g = 1.0 / X.shape[1]
    hp = jax.lax.Precision.HIGHEST
    KXX = (g * jnp.dot(X, X.T, precision=hp) + coef0) ** degree
    KYY = (g * jnp.dot(Y, Y.T, precision=hp) + coef0) ** degree
    KXY = (g * jnp.dot(X, Y.T, precision=hp) + coef0) ** degree
    return KXX.mean() + KYY.mean() - 2.0 * KXY.mean()


def _preprocess_ref(video, mean, std):
    y = (jnp.clip(video, -1.0, 1.0) + 1.0) * 0.5
    return (y - mean[None, :, None, None, None]) / std[None, :, None, None, None]


if __name__ == "__main__":
    key = jax.random.PRNGKey(0)
    k_vid, k_t, k_r = jax.random.split(key, 3)

    # ---- small synthetic video: [B, C, T, H, W] in [-1, 1] --------------------
    B, C, T, H, W = 2, 3, 4, 16, 16
    frames_per_clip = 6
    video = jax.random.uniform(k_vid, (B, C, T, H, W), jnp.float32, -1.0, 1.0)

    mean = jnp.array([0.485, 0.456, 0.406], jnp.float32)
    std = jnp.array([0.229, 0.224, 0.225], jnp.float32)

    # TODO(synk): bicubic v2.Resize has no clean Pallas equivalent here; the
    # synthetic video is already generated at the working resolution.
    prep = preprocess_video(video, mean, std)
    prep = pad_frames(prep, frames_per_clip)
    jax.block_until_ready(prep)

    prep_ref = pad_frames(_preprocess_ref(video, mean, std), frames_per_clip)
    assert np.allclose(np.asarray(prep), np.asarray(prep_ref), atol=1e-5, rtol=1e-5)

    # ---- synthetic pooled features (stand-in for V-JEPA + attentive pooler) ---
    # TODO(synk): the pretrained ViT-L V-JEPA backbone / ClipAggregation /
    # AttentiveClassifier pooler are checkpoint models and are not reproduced;
    # features of the correct shape [n_samples, embed_dim] are synthesized.
    N_TGT, N_REC, DIM = 16, 8, 128
    target_feats = jax.random.normal(k_t, (N_TGT, DIM), jnp.float32)
    recon_feats = jax.random.normal(k_r, (N_REC, DIM), jnp.float32) * 1.1 + 0.05

    jedi = jedi_gather(target_feats, recon_feats)
    jax.block_until_ready(jedi)

    jedi_ref = _mmd_poly_ref(target_feats, recon_feats) * 100.0
    assert np.allclose(float(jedi), float(jedi_ref), atol=1e-3, rtol=2e-3), (
        float(jedi), float(jedi_ref))

    print("KERNEL_OK")
</pallas_src>

<mosaic_0001>
module attributes {stable_mosaic.version = 11 : i64} {
  func.func @_preprocess_kernel(%arg0: i32, %arg1: i32, %arg2: memref<3xf32, #tpu.memory_space<smem>>, %arg3: memref<3xf32, #tpu.memory_space<smem>>, %arg4: memref<1x1x1024xf32, #tpu.memory_space<vmem>>, %arg5: memref<1x1x1024xf32, #tpu.memory_space<vmem>>) attributes {dimension_semantics = [#tpu.dimension_semantics<parallel>, #tpu.dimension_semantics<parallel>], iteration_bounds = array<i64: 6, 1>, scalar_prefetch = 2 : i64, scratch_operands = 0 : i64, tpu.core_type = #tpu.core_type<tc>, window_params = [{transform_indices = @transform_0, window_bounds = array<i64: 1, 1, 1024>}, {transform_indices = @transform_1, window_bounds = array<i64: 1, 1, 1024>}]} {
    %c3_i32 = arith.constant 3 : i32
    %c0_i32 = arith.constant 0 : i32
    %0 = arith.cmpi eq, %c3_i32, %c0_i32 : i32
    %c1_i32 = arith.constant 1 : i32
    %1 = arith.select %0, %c1_i32, %c3_i32 : i32
    %2 = arith.remsi %arg0, %1 : i32
    %c0_i32_0 = arith.constant 0 : i32
    %3 = arith.cmpi ne, %2, %c0_i32_0 : i32
    %c0_i32_1 = arith.constant 0 : i32
    %4 = arith.cmpi slt, %2, %c0_i32_1 : i32
    %c0_i32_2 = arith.constant 0 : i32
    %5 = arith.cmpi slt, %1, %c0_i32_2 : i32
    %6 = arith.xori %4, %5 : i1
    %7 = arith.andi %6, %3 : i1
    %8 = arith.addi %2, %1 : i32
    %9 = arith.select %7, %8, %2 : i32
    %c0 = arith.constant 0 : index
    %c0_3 = arith.constant 0 : index
    %c0_4 = arith.constant 0 : index
    %10 = vector.load %arg4[%c0, %c0_3, %c0_4] : memref<1x1x1024xf32, #tpu.memory_space<vmem>>, vector<1x1x1024xf32>
    %11 = vector.shape_cast %10 : vector<1x1x1024xf32> to vector<1x1024xf32>
    %cst = arith.constant -1.000000e+00 : f32
    %cst_5 = arith.constant 1.000000e+00 : f32
    %12 = vector.broadcast %cst : f32 to vector<1x1024xf32>
    %13 = arith.maximumf %12, %11 : vector<1x1024xf32>
    %14 = vector.broadcast %cst_5 : f32 to vector<1x1024xf32>
    %15 = arith.minimumf %14, %13 : vector<1x1024xf32>
    %16 = arith.index_cast %9 : i32 to index
    %17 = memref.load %arg2[%16] : memref<3xf32, #tpu.memory_space<smem>>
    %18 = vector.broadcast %17 : f32 to vector<1x1024xf32>
    %19 = arith.mulf %15, %18 : vector<1x1024xf32>
    %20 = arith.index_cast %9 : i32 to index
    %21 = memref.load %arg3[%20] : memref<3xf32, #tpu.memory_space<smem>>
    %22 = vector.broadcast %21 : f32 to vector<1x1024xf32>
    %23 = arith.addf %19, %22 : vector<1x1024xf32>
    %c0_6 = arith.constant 0 : index
    %c0_7 = arith.constant 0 : index
    %c0_8 = arith.constant 0 : index
    %24 = vector.load %arg5[%c0_6, %c0_7, %c0_8] : memref<1x1x1024xf32, #tpu.memory_space<vmem>>, vector<1x1x1024xf32>
    %25 = vector.shape_cast %24 : vector<1x1x1024xf32> to vector<1x1024xf32>
    %26 = vector.shape_cast %23 : vector<1x1024xf32> to vector<1x1x1024xf32>
    tpu.vector_store %arg5[%c0_6, %c0_7, %c0_8], %26 {strides = array<i32>} : memref<1x1x1024xf32, #tpu.memory_space<vmem>>, vector<1x1x1024xf32>,
    return
  }
  func.func @transform_0(%arg0: i32, %arg1: i32, %arg2: memref<3xf32, #tpu.memory_space<smem>>, %arg3: memref<3xf32, #tpu.memory_space<smem>>) -> (i32, i32, i32) {
    %c0_i32 = arith.constant 0 : i32
    %c0_i32_0 = arith.constant 0 : i32
    return %arg0, %arg1, %c0_i32 : i32, i32, i32
  }
  func.func @transform_1(%arg0: i32, %arg1: i32, %arg2: memref<3xf32, #tpu.memory_space<smem>>, %arg3: memref<3xf32, #tpu.memory_space<smem>>) -> (i32, i32, i32) {
    %c0_i32 = arith.constant 0 : i32
    %c0_i32_0 = arith.constant 0 : i32
    return %arg0, %arg1, %c0_i32 : i32, i32, i32
  }
}

</mosaic_0001>

<bundles_post_ra>
// kernel: tpu_custom_call.1
= control target key start
LH: loop header
LB: loop body
LE: loop exit
PB: predicated region body
PF: predicated region fallthrough
CT: control target
= control target key end

     0   :  { %s515_s18 = smov [#allocation3]   ;;  %s516_s19 = smov [#allocation4]   ;;  %s664_s0 = inlined_call_operand.hbm [shape: f32[3], index: 0, kind: input, shape index: {}]   ;;  %s665_s2 = inlined_call_operand.hbm [shape: f32[6,1,1024], index: 2, kind: input, shape index: {}]   ;;  %s666_s3 = inlined_call_operand.hbm [shape: f32[6,1,1024], index: 3, kind: output, shape index: {}]   ;;  %s667_s1 = inlined_call_operand.hbm [shape: f32[3], index: 1, kind: input, shape index: {}]  }
   0x1   :  { %s9_s14 = sshll.u32 %s664_s0, 4  ;;  %s14_s17 = sshll.u32 %s667_s1, 4  ;;  %s10_s14 = int_to_ptr.hbm [resolvable:$true] %s9_s14  ;;  %s15_s17 = int_to_ptr.hbm [resolvable:$true] %s14_s17 }
   0x2   :  { %12 = dma.hbm_to_smem %s10_s14, 16, %s515_s18, [#allocation2] }
   0x3   :  { %17 = dma.hbm_to_smem %s15_s17, 16, %s516_s19, [#allocation2] }
   0x4   :  { %481 = dma.done.wait [#allocation2], 32 }
   0x5   :  { %482 = vsyncadd [#allocation2], 4294967264 }
   0x6   :  { %20 = sfence }
   0x7   :  { %21 = vsyncpa [#allocation6], 0 }
   0x8   :  { %23 = vsyncpa [#allocation6 + $0x1], 0 }
   0x9   :  { %24 = vsyncpa [#allocation7], 0 }
   0xa   :  { %26 = vsyncpa [#allocation7 + $0x1], 0  ;;  %s543_s20 = smov 0   ;;  %s545_s0 = smov 0  }
   0xb   :  { %s547_s21 = smov 0   ;;  %s549_s1 = smov 0  }
   0xc   :  { %s551_s22 = smov 0   ;;  %s553_s23 = smov 0  }
   0xd LB: > { %s290_s24 = sadd.s32 4294967295, %s513_s23   ;;  %s291_s25 = sadd.s32 4294967294, %s513_s23   ;;  %s513_s23 = sphi %s553_s23, %s32_s23   ;;  %s509_s22 = sphi %s551_s22, %s676_s22   ;;  %s505_s1 = sphi %s549_s1, %s675_s1   ;;  %s501_s21 = sphi %s547_s21, %s674_s21   ;;  %s497_s0 = sphi %s545_s0, %s673_s0   ;;  %s493_s20 = sphi %s543_s20, %s672_s20  }
   0xe   : > { %s44_s26 = sadd.s32 1, %s509_s22  ;;  %s53_s27 = sadd.s32 1, %s501_s21 }
   0xf   : > { %p46_p0 = scmp.ge.s32.totalorder %s44_s26, 6  ;;  %p60_p1 = scmp.ne.s32.totalorder %s501_s21, %s497_s0 }
  0x10   : > { %p61_p2 = scmp.eq.s32.totalorder %s513_s23, 0  ;;  %p66_p3 = scmp.ne.s32.totalorder %s497_s0, %s493_s20 }
  0x11   : > { %s678_s26 = smov (%p46_p0, %s44_s26), 0  ;;  %p67_p5 = scmp.eq.s32.totalorder %s290_s24, 0 }
  0x12   : > { %p584_p4 = por %p61_p2, %p60_p1  ;;  %s48_s29 = ssub.s32 %s509_s22, %s678_s26 }
  0x13   : > { %p92_p6 = scmp.eq.s32.totalorder %s290_s24, 5  ;;  %p51_p7 = scmp.eq.s32.totalorder %s48_s29, 0 }
  0x14   : > { %p590_p8 = por %p67_p5, %p66_p3  ;;  %p98_p10 = scmp.eq.s32.totalorder %s291_s25, 5 }
  0x15   : > { %p594_p9 = por %p92_p6, %p60_p1  ;;  %p319_p12 = scmp.lt.s32.totalorder %s513_s23, 6 }
  0x16   : > { %s599_s5 = scalar_select %p51_p7, %s501_s21, %s53_s27  }
  0x17   : > { %p601_p11 = por %p98_p10, %p66_p3  ;;  %s118_s7 = sand.u32 1, %s501_s21  }
  0x18   : > { %s294_s8 = sshll.u32 %s118_s7, 3  ;;  %s295_s9 = sshll.u32 %s509_s22, 3 }
  0x19   : > { %s128_s12 = scalar_lea.hbm %s665_s2, %s295_s9  ;;  %s122_s13 = scalar_lea.vmem [#allocation5], %s294_s8 }
  0x1a   : > { %s132_s14 = sshll.u32 %s122_s13, 4  ;;  %s130_s15 = sshll.u32 %s128_s12, 4  ;;  %s133_s14 = int_to_ptr.vmem [resolvable:$true] %s132_s14  ;;  %s131_s15 = int_to_ptr.hbm [resolvable:$true] %s130_s15 }
  0x1b   : > { %p312_p13 = pnand %p319_p12, %p584_p4  ;;  %p296_p0 = scmp.ge.s32.totalorder %s513_s23, 1 }
  0x1c   : > { %p137_p1 = scmp.lt.s32.totalorder %s513_s23, 7  ;;  %s119_s16 = scalar_lea.sflag [#allocation6], %s118_s7 }
  0x1d   : > { %314 = dma.hbm_to_vmem [thread:$0]  (!%p312_p13), %s131_s15, 128, %s133_s14, %s119_s16  }
  0x1e   : > { %p138_p2 = pnand %p296_p0, %p137_p1 }
  0x1f   : > { %s616_s17 = sand.u32 (!%p138_p2), 1, %s497_s0  }
  0x20   : > { %141 = sbr.rel (%p138_p2) target bundleno = 70 (0x46), region = 24  ;;  %s297_s18 = sshll.u32 (!%p138_p2), %s616_s17, 3 }
  0x21   : > { %s144_s19 = scalar_lea.sflag (!%p138_p2), [#allocation6], %s616_s17  ;;  %s147_s24 = scalar_lea.vmem (!%p138_p2), [#allocation5], %s297_s18 }
  0x25   : > { %484 = dma.done.wait (%p590_p8), %s144_s19, 128  }
  0x26   : > { %486 = vsyncadd (%p590_p8), %s144_s19, 4294967168  ;;  %s168_s25 = ssub.s32 0, %s505_s1  ;;  %p167_p3 = scmp.lt.s32.totalorder %s505_s1, 0  ;;  %v180_v0 = vld [vmem:[%s147_s24] sm:$0xff] }
  0x27   : > { %s299_s27 = smin.u32 %s505_s1, %s168_s25  ;;  %s304_s30 = sshll.u32 %s505_s1, 3  ;;  %v302_v1 = vclamps-f32 %v180_v0, 1.0 }
  0x28   : > { %372 = sdivrem.u32 %s299_s27, 3  ;;  %s203_s13 = scalar_lea.hbm %s666_s3, %s304_s30 }
  0x29   : > { %s166_s14 = scalar_lea.vmem [#allocation8], %s297_s18  ;;  %s207_s16 = sshll.u32 %s203_s13, 4  ;;  %s208_s16 = int_to_ptr.hbm [resolvable:$true] %s207_s16 }
  0x2a   : > { %s205_s15 = sshll.u32 %s166_s14, 4  ;;  %s191_s19 = scalar_lea.sflag [#allocation7], %s616_s17  ;;  %s206_s15 = int_to_ptr.vmem [resolvable:$true] %s205_s15 }
  0x2b   : > { %s443_s24 = sshra.s32 %s208_s16, 4  ;;  %s449_s18 = scalar_lea.hbm %s666_s3, 48  ;;  %s444_s24 = int_to_ptr.hbm [resolvable:$true] %s443_s24 }
  0x2c   : > { %s445_s1 = scalar_lea.hbm %s444_s24, 8  ;;  %p450_p8 = scmp.lt.s32.totalorder %s444_s24, %s666_s3 }
  0x2d   : > { %p446_p5 = scmp.ne.s32.totalorder %s444_s24, %s445_s1  ;;  %p451_p10 = scmp.lt.s32.totalorder %s449_s18, %s445_s1 }
  0x2f   : > { %p447_p6 = pnand %p446_p5, %p594_p9  ;;  %p452_p12 = por %p451_p10, %p450_p8 }
  0x31   : > { %s373_s28 = spop.drf %372  ;;  %p448_p7 = pneg %p447_p6 }
  0x32   : > { %s374_s29 = spop.drf %372 }
  0x33   : > { %s172_s7 = ssub.s32 0, %s374_s29  ;;  %p453_p13 = pnand %p452_p12, %p448_p7 }
  0x34   : > { %s680_s7 = smov (!%p167_p3, %s172_s7), %s374_s29 }
  0x35   : > { %p301_p4 = scmp.lt.s32.totalorder %s680_s7, 0  ;;  %s178_s8 = sadd.s32 3, %s680_s7 }
  0x37   : > { %s682_s8 = smov (!%p301_p4, %s178_s8), %s680_s7 }
  0x38   : > { %s183_s9 = sld [smem:[#allocation3 + %s682_s8]] }
  0x39   : > { %s186_s10 = sld [smem:[#allocation4 + %s682_s8]] }
  0x3e   : > { %v184_v2 = vstv %s183_s9 }
  0x3f   : > { %v185_v3 = vmul.f32 %v302_v1, %v184_v2  ;;  %v187_v4 = vstv %s186_s10 }
  0x41   : > { %v188_v5 = vadd.f32 %v187_v4, %v185_v3 }
  0x43   : > { %189 = vst [vmem:[%s166_s14] sm:$0xff] %v188_v5 }
  0x44   : > { %456 = shalt.err (!%p453_p13)
}
  0x45   : > { %309 = dma.vmem_to_hbm [thread:$0]  (%p594_p9), %s206_s15, 128, %s208_s16, %s191_s19  }
  0x46 PF: > { %p320_p0 = scmp.ge.s32.totalorder %s513_s23, 2  ;;  %s219_s17 = sand.u32 1, %s493_s20  }
  0x47   : > { %s220_s7 = scalar_lea.sflag [#allocation7], %s219_s17 }
  0x48   : > { %p316_p1 = pnand %p320_p0, %p601_p11 }
  0x4a   : > { %p317_p2 = pneg %p316_p1 }
  0x4c   : > { %488 = dma.done.wait (%p317_p2), %s220_s7, 128  }
  0x4d   : > { %490 = vsyncadd (%p317_p2), %s220_s7, 4294967168  ;;  %s32_s23 = sadd.s32 1, %s513_s23   ;;  %s672_s20 = smov %s497_s0 }
  0x4e   : > { %p29_p3 = scmp.ge.s32.totalorder %s32_s23, 8   ;;  %s673_s0 = smov %s501_s21 }
  0x4f   : > { %s674_s21 = smov %s599_s5  ;;  %s675_s1 = smov %s509_s22 }
  0x50   : > { %s676_s22 = smov %s678_s26  ;;  %31 = sbr.rel (!%p29_p3) target bundleno = 13 (0xd), region = 69 }
  0x55   :  { %226 = vsyncpa [#allocation6], 1 }
  0x56   :  { %228 = vsyncpa [#allocation6 + $0x1], 1 }
  0x57   :  { %229 = vsyncpa [#allocation7], 1 }
  0x58   :  { %231 = vsyncpa [#allocation7 + $0x1], 1 }

</bundles_post_ra>
